<compile_context>
chip_gen: v7x
topology: tpu7x:2x2x1
jax: 0.10.0
libtpu: 0.0.40
codegen_flags: <defaults>
</compile_context>

<pallas_src>
import math

import jax
import jax.numpy as jnp
from jax.experimental import pallas as pl
from jax.experimental.pallas import tpu as pltpu


def build_pe(max_len: int, d_model: int) -> jnp.ndarray:
    """Buffer setup (plain JAX glue) — identical to the PyTorch __init__."""
    position = jnp.arange(max_len, dtype=jnp.float32)[:, None]                # (max_len, 1)
    div_term = jnp.exp(
        jnp.arange(0, d_model, 2, dtype=jnp.float32) * (-math.log(10000.0) / d_model)
    )                                                                          # (d_model/2,)
    pe = jnp.zeros((max_len, d_model), dtype=jnp.float32)
    pe = pe.at[:, 0::2].set(jnp.sin(position * div_term))
    pe = pe.at[:, 1::2].set(jnp.cos(position * div_term))
    return pe


def _pick_fold(S: int, D: int) -> int:
    """Smallest k with S % k == 0 and (k*D) % 128 == 0 -> lane-dense stores."""
    if D % 128 == 0:
        return 1
    for k in range(1, min(S, 128) + 1):
        if S % k == 0 and (k * D) % 128 == 0:
            return k
    return 1  # fallback: masked stores, still correct


def _pick_tile_rows(R: int, W: int, itemsize: int, budget_bytes: int = 8 << 20) -> int:
    """3 blocks (x, pe, out) x 2 pipeline buffers each must fit the budget."""
    max_rows = max(1, budget_bytes // (6 * W * itemsize))
    if R <= max_rows:
        return R
    t = (max_rows // 8) * 8
    while t >= 8:
        if R % t == 0:
            return t
        t -= 8
    return R  # no multiple-of-8 divisor fits; full extent is always a legal block


def positional_encoding_forward(x, pe, *, p=0.1, training=True, seed=0, tile_rows=None):
    """x: (B, S, D).  pe: (max_len, D).  Returns dropout(x + pe[:S]) with inverted dropout."""
    B, S, D = x.shape
    assert S <= pe.shape[0] and pe.shape[1] == D

    # Lane-dense view: (B, S, D) -> (B, R, W) with W = k*D a multiple of 128 when possible.
    k = _pick_fold(S, D)
    R, W = S // k, k * D
    x_v = x.reshape(B, R, W)
    pe_v = pe[:S].astype(x.dtype).reshape(R, W)

    if tile_rows is None:
        tile_rows = _pick_tile_rows(R, W, x.dtype.itemsize)
    assert R % tile_rows == 0
    grid = (R // tile_rows, B)  # B innermost -> pe block reused across the batch

    apply_dropout = bool(training) and float(p) > 0.0
    # uint32 threshold: drop iff hash < p * 2^32  (single integer compare, no f32 convert)
    thr_val = min(int(round(float(p) * (1 << 32))), (1 << 32) - 1)
    inv_keep = 1.0 / (1.0 - float(p)) if float(p) < 1.0 else 0.0

    def kernel(seed_ref, x_ref, pe_ref, o_ref):
        # Hot path: VPU broadcast-add of the positional encoding.
        y = x_ref[...] + pe_ref[...]                                  # (tile_rows, W)
        if apply_dropout:
            # TODO(synk): RNG stream cannot bit-match torch.nn.Dropout; semantics
            # (Bernoulli keep-prob 1-p, scale 1/(1-p)) are reproduced with a
            # stateless per-element counter hash (portable: TPU + interpret mode).
            r = pl.program_id(0)
            b = pl.program_id(1)
            row = jax.lax.broadcasted_iota(jnp.int32, (tile_rows, W), 0) + r * tile_rows
            col = jax.lax.broadcasted_iota(jnp.int32, (tile_rows, W), 1)
            idx = (b * (R * W) + row * W + col).astype(jnp.uint32)    # unique per element
            s_u = seed_ref[0].astype(jnp.uint32)
            # splitmix32-style finalizer, seed mixed via a large odd constant
            h = idx * jnp.uint32(0x9E3779B1) + s_u * jnp.uint32(0x85EBCA6B)
            h = (h ^ (h >> 16)) * jnp.uint32(0x7FEB352D)
            h = (h ^ (h >> 15)) * jnp.uint32(0x846CA68B)
            h = h ^ (h >> 16)
            keep = h >= jnp.uint32(thr_val)
            y = jnp.where(keep, y * jnp.asarray(inv_keep, dtype=y.dtype), jnp.zeros_like(y))
        o_ref[...] = y.astype(o_ref.dtype)

    out_v = pl.pallas_call(
        kernel,
        out_shape=jax.ShapeDtypeStruct((B, R, W), x.dtype),
        grid_spec=pltpu.PrefetchScalarGridSpec(
            num_scalar_prefetch=1,
            grid=grid,
            in_specs=[
                # batch dim squeezed out of the kernel view
                pl.BlockSpec((None, tile_rows, W), lambda r, b, seed: (b, r, 0)),
                # pe block index independent of b -> DMA'd once per row-tile, reused over batch
                pl.BlockSpec((tile_rows, W), lambda r, b, seed: (r, 0)),
            ],
            out_specs=pl.BlockSpec((None, tile_rows, W), lambda r, b, seed: (b, r, 0)),
        ),
        compiler_params=pltpu.CompilerParams(
            dimension_semantics=("parallel", "parallel")
        ),
    )(jnp.array([seed], dtype=jnp.int32), x_v, pe_v)

    return out_v.reshape(B, S, D)


if __name__ == "__main__":
    B, S, D = 2, 8, 32
    max_len = 64
    p = 0.1

    key = jax.random.PRNGKey(0)
    x = jax.random.normal(key, (B, S, D), dtype=jnp.float32)
    pe = build_pe(max_len, D)
    ref = x + pe[None, :S, :]

    # Eval mode (dropout = identity): exact match against reference.
    out_eval = jax.block_until_ready(
        positional_encoding_forward(x, pe, p=p, training=False)
    )
    assert out_eval.shape == (B, S, D)
    assert jnp.allclose(out_eval, ref, atol=1e-6), "eval-mode mismatch"

    # Training mode: every element is either exactly 0 (dropped) or ref/(1-p) (kept).
    out_train = jax.block_until_ready(
        positional_encoding_forward(x, pe, p=p, training=True, seed=1234)
    )
    assert out_train.shape == (B, S, D)
    scaled = ref / (1.0 - p)
    is_kept = jnp.isclose(out_train, scaled, atol=1e-5, rtol=1e-5)
    is_dropped = jnp.abs(out_train) <= 1e-6
    assert bool(jnp.all(is_kept | is_dropped)), "training-mode values mismatch"
    assert bool(jnp.any(is_kept)), "dropout dropped everything (suspicious)"

    # Second shape exercising the D % 128 == 0 (no-fold) path.
    x2 = jax.random.normal(jax.random.PRNGKey(1), (2, 16, 128), dtype=jnp.float32)
    pe2 = build_pe(64, 128)
    out2 = jax.block_until_ready(
        positional_encoding_forward(x2, pe2, p=p, training=False)
    )
    assert jnp.allclose(out2, x2 + pe2[None, :16, :], atol=1e-6), "no-fold path mismatch"

    print("KERNEL_OK")
</pallas_src>

<mosaic_0001>
module attributes {stable_mosaic.version = 11 : i64} {
  func.func @kernel(%arg0: i32, %arg1: i32, %arg2: memref<1xi32, #tpu.memory_space<smem>>, %arg3: memref<1x2x128xf32, #tpu.memory_space<vmem>>, %arg4: memref<2x128xf32, #tpu.memory_space<vmem>>, %arg5: memref<1x2x128xf32, #tpu.memory_space<vmem>>) attributes {dimension_semantics = [#tpu.dimension_semantics<parallel>, #tpu.dimension_semantics<parallel>], iteration_bounds = array<i64: 1, 2>, scalar_prefetch = 1 : i64, scratch_operands = 0 : i64, tpu.core_type = #tpu.core_type<tc>, window_params = [{transform_indices = @transform_0, window_bounds = array<i64: 1, 2, 128>}, {transform_indices = @transform_1, window_bounds = array<i64: 2, 128>}, {transform_indices = @transform_2, window_bounds = array<i64: 1, 2, 128>}]} {
    %c0 = arith.constant 0 : index
    %c0_0 = arith.constant 0 : index
    %c0_1 = arith.constant 0 : index
    %0 = vector.load %arg3[%c0, %c0_0, %c0_1] : memref<1x2x128xf32, #tpu.memory_space<vmem>>, vector<1x2x128xf32>
    %1 = vector.shape_cast %0 : vector<1x2x128xf32> to vector<2x128xf32>
    %c0_2 = arith.constant 0 : index
    %c0_3 = arith.constant 0 : index
    %2 = vector.load %arg4[%c0_2, %c0_3] : memref<2x128xf32, #tpu.memory_space<vmem>>, vector<2x128xf32>
    %3 = arith.addf %1, %2 : vector<2x128xf32>
    %c0_4 = arith.constant 0 : index
    %c0_5 = arith.constant 0 : index
    %c0_6 = arith.constant 0 : index
    %4 = vector.load %arg5[%c0_4, %c0_5, %c0_6] : memref<1x2x128xf32, #tpu.memory_space<vmem>>, vector<1x2x128xf32>
    %5 = vector.shape_cast %4 : vector<1x2x128xf32> to vector<2x128xf32>
    %6 = vector.shape_cast %3 : vector<2x128xf32> to vector<1x2x128xf32>
    tpu.vector_store %arg5[%c0_4, %c0_5, %c0_6], %6 {strides = array<i32>} : memref<1x2x128xf32, #tpu.memory_space<vmem>>, vector<1x2x128xf32>,
    return
  }
  func.func @transform_0(%arg0: i32, %arg1: i32, %arg2: memref<1xi32, #tpu.memory_space<smem>>) -> (i32, i32, i32) {
    %c0_i32 = arith.constant 0 : i32
    %c0_i32_0 = arith.constant 0 : i32
    return %arg1, %arg0, %c0_i32 : i32, i32, i32
  }
  func.func @transform_1(%arg0: i32, %arg1: i32, %arg2: memref<1xi32, #tpu.memory_space<smem>>) -> (i32, i32) {
    %c0_i32 = arith.constant 0 : i32
    %c0_i32_0 = arith.constant 0 : i32
    return %arg0, %c0_i32 : i32, i32
  }
  func.func @transform_2(%arg0: i32, %arg1: i32, %arg2: memref<1xi32, #tpu.memory_space<smem>>) -> (i32, i32, i32) {
    %c0_i32 = arith.constant 0 : i32
    %c0_i32_0 = arith.constant 0 : i32
    return %arg1, %arg0, %c0_i32 : i32, i32, i32
  }
}

</mosaic_0001>

<bundles_post_ra>
// kernel: tpu_custom_call.1
= control target key start
LH: loop header
LB: loop body
LE: loop exit
PB: predicated region body
PF: predicated region fallthrough
CT: control target
= control target key end

     0   :  { %9 = vsyncpa [#allocation5], 0  ;;  %s696_s0 = inlined_call_operand.<no memory space> [shape: s32[1], index: 0, kind: input, shape index: {}]   ;;  %s697_s1 = inlined_call_operand.hbm [shape: f32[2,2,128], index: 1, kind: input, shape index: {}]   ;;  %s698_s2 = inlined_call_operand.vmem [shape: f32[2,128], index: 2, kind: input, shape index: {}]   ;;  %s699_s3 = inlined_call_operand.hbm [shape: f32[2,2,128], index: 3, kind: output, shape index: {}]  }
   0x1   :  { %11 = vsyncpa [#allocation5 + $0x1], 0 }
   0x2   :  { %12 = vsyncpa [#allocation6], 0 }
   0x3   :  { %14 = vsyncpa [#allocation6 + $0x1], 0  ;;  %s521_s12 = smov 0   ;;  %s523_s13 = smov 0  }
   0x4   :  { %s525_s14 = smov 0   ;;  %s527_s0 = smov 0  }
   0x5   :  { %s529_s15 = smov 0   ;;  %s531_s16 = smov 0  }
   0x6 LB: > { %s309_s17 = sadd.s32 4294967295, %s497_s16   ;;  %s310_s18 = sadd.s32 4294967294, %s497_s16   ;;  %s497_s16 = sphi %s531_s16, %s20_s16   ;;  %s493_s15 = sphi %s529_s15, %s715_s15   ;;  %s489_s0 = sphi %s527_s0, %s714_s0   ;;  %s485_s14 = sphi %s525_s14, %s713_s14   ;;  %s481_s13 = sphi %s523_s13, %s712_s13   ;;  %s477_s12 = sphi %s521_s12, %s711_s12  }
   0x7   : > { %s29_s19 = sadd.s32 1, %s493_s15  ;;  %s41_s20 = sadd.s32 1, %s485_s14 }
   0x8   : > { %p30_p0 = scmp.ge.s32.totalorder %s29_s19, 2  ;;  %p48_p1 = scmp.ne.s32.totalorder %s485_s14, %s481_s13 }
   0x9   : > { %p49_p2 = scmp.eq.s32.totalorder %s497_s16, 0  ;;  %p54_p3 = scmp.ne.s32.totalorder %s481_s13, %s477_s12 }
   0xa   : > { %s717_s19 = smov (%p30_p0, %s29_s19), 0  ;;  %p55_p5 = scmp.eq.s32.totalorder %s309_s17, 0 }
   0xb   : > { %p562_p4 = por %p49_p2, %p48_p1  ;;  %s36_s22 = ssub.s32 %s493_s15, %s717_s19 }
   0xc   : > { %p106_p6 = scmp.eq.s32.totalorder %s309_s17, 1  ;;  %p39_p7 = scmp.eq.s32.totalorder %s36_s22, 0 }
   0xd   : > { %p568_p8 = por %p55_p5, %p54_p3  ;;  %p112_p10 = scmp.eq.s32.totalorder %s310_s18, 1 }
   0xe   : > { %p572_p9 = por %p106_p6, %p48_p1  ;;  %p335_p13 = scmp.lt.s32.totalorder %s497_s16, 2 }
   0xf   : > { %s577_s25 = scalar_select %p39_p7, %s485_s14, %s41_s20  }
  0x10   : > { %s703_s24 = scalar_select %p572_p9, 1, 0 }
  0x11   : > { %p579_p11 = por %p112_p10, %p54_p3  ;;  %s139_s27 = sand.u32 1, %s485_s14  }
  0x12   : > { %s314_s28 = sshll.u32 %s139_s27, 1  ;;  %s315_s29 = sshll.u32 %s493_s15, 5 }
  0x13   : > { %s704_s26 = scalar_select %p579_p11, 1, 0 }
  0x14   : > { %s590_s5 = scalar_lea.hbm %s697_s1, %s315_s29  ;;  %s143_s6 = scalar_lea.vmem [#allocation4], %s314_s28 }
  0x15   : > { %s151_s7 = sshll.u32 %s143_s6, 4  ;;  %p596_p0 = pnand %p335_p13, %p562_p4  ;;  %s592_s7 = int_to_ptr.vmem [resolvable:$true] %s151_s7 }
  0x16   : > { %s140_s9 = scalar_lea.sflag [#allocation5], %s139_s27  ;;  %s385_s10 = scalar_lea.hbm %s590_s5, 32 }
  0x17   : > { %p386_p3 = scmp.ne.s32.totalorder %s590_s5, %s385_s10  ;;  %p387_p5 = pneg %p596_p0 }
  0x18   : > { %s390_s18 = scalar_lea.hbm %s697_s1, 64  ;;  %p391_p4 = scmp.lt.u32.totalorder %s590_s5, %s697_s1 }
  0x19   : > { %p388_p6 = pnand %p387_p5, %p386_p3  ;;  %p392_p10 = scmp.lt.u32.totalorder %s390_s18, %s385_s10 }
  0x1a   : > { %p394_p12 = scmp.lt.u32.totalorder %s385_s10, %s590_s5 }
  0x1b   : > { %p389_p7 = pneg %p388_p6  ;;  %p393_p13 = por %p392_p10, %p391_p4 }
  0x1d   : > { %p395_p1 = por %p394_p12, %p393_p13 }
  0x1f   : > { %p396_p2 = pnand %p395_p1, %p389_p7 }
  0x21   : > { %399 = shalt.err (!%p396_p2)
}
  0x22   : > { %s400_s22 = scalar_lea.vmem %s592_s7, 32  ;;  %s499_s27 = smov [#allocation4]  }
  0x23   : > { %p401_p3 = scmp.ne.s32.totalorder %s592_s7, %s400_s22  ;;  %s405_s28 = sshll.u32 %s499_s27, 4  ;;  %s406_s28 = int_to_ptr.vmem [resolvable:$false] %s405_s28 }
  0x24   : > { %s407_s29 = scalar_lea.vmem %s406_s28, 64  ;;  %p408_p9 = scmp.lt.s32.totalorder %s592_s7, %s406_s28 }
  0x25   : > { %p403_p6 = pnand %p401_p3, %p387_p5  ;;  %p409_p4 = scmp.lt.s32.totalorder %s407_s29, %s400_s22 }
  0x27   : > { %p404_p11 = pneg %p403_p6  ;;  %p410_p10 = por %p409_p4, %p408_p9 }
  0x29   : > { %p411_p12 = pnand %p410_p10, %p404_p11 }
  0x2b   : > { %414 = shalt.err (!%p411_p12)
}
  0x2c   : > { %330 = dma.hbm_to_vmem [thread:$0]  (!%p596_p0), %s590_s5, 32, %s592_s7, %s140_s9  }
  0x2d   : > { %p706_p1 = scmp.lt.s32.totalorder %s497_s16, 3  ;;  %p707_p2 = scmp.ge.s32.totalorder %s497_s16, 1 }
  0x2f   : > { %p157_p5 = pnand %p707_p2, %p706_p1 }
  0x30   : > { %s632_s30 = sand.u32 (!%p157_p5), 1, %s481_s13  }
  0x31   : > { %160 = sbr.rel (%p157_p5) target bundleno = 83 (0x53), region = 28  ;;  %s317_s4 = sshll.u32 (!%p157_p5), %s632_s30, 1 }
  0x32   : > { %s163_s6 = scalar_lea.sflag (!%p157_p5), [#allocation5], %s632_s30  ;;  %s166_s10 = scalar_lea.vmem (!%p157_p5), [#allocation4], %s317_s4 }
  0x38   : > { %468 = dma.done.wait (%p568_p8), %s163_s6, 32  }
  0x39   : > { %470 = vsyncadd (%p568_p8), %s163_s6, 4294967264  ;;  %s190_s5 = scalar_lea.vmem [#allocation7], %s317_s4  ;;  %s320_s8 = sshll.u32 %s489_s0, 5  ;;  %v195_v0 = vld [vmem:[%s166_s10] sm:$0x3] }
  0x3a   : > { %s214_s7 = sshll.u32 %s190_s5, 4  ;;  %v196_v1 = vld [vmem:[%s698_s2] sm:$0x3]  ;;  %s649_s23 = scalar_lea.hbm %s699_s3, %s320_s8  ;;  %s644_s7 = int_to_ptr.vmem [resolvable:$true] %s214_s7 }
  0x3b   : > { %v197_v2 = vadd.f32 %v196_v1, %v195_v0  ;;  %s200_s20 = scalar_lea.sflag [#allocation6], %s632_s30  ;;  %s415_s21 = scalar_lea.vmem %s644_s7, 32 }
  0x3c   : > { %p416_p8 = scmp.ne.s32.totalorder %s644_s7, %s415_s21  ;;  %p708_p9 = scmp.ne.s32.totalorder %s703_s24, 0 }
  0x3d   : > { %198 = vst [vmem:[%s190_s5] sm:$0x3] %v197_v2  ;;  %s500_s0 = smov [#allocation7]  }
  0x3e   : > { %p417_p11 = pnand %p416_p8, %p708_p9  ;;  %s419_s22 = sshll.u32 %s500_s0, 4  ;;  %s420_s22 = int_to_ptr.vmem [resolvable:$false] %s419_s22 }
  0x3f   : > { %s421_s27 = scalar_lea.vmem %s420_s22, 64  ;;  %p422_p7 = scmp.lt.s32.totalorder %s644_s7, %s420_s22 }
  0x40   : > { %p418_p0 = pneg %p417_p11  ;;  %p423_p13 = scmp.lt.s32.totalorder %s421_s27, %s415_s21 }
  0x42   : > { %p424_p3 = por %p423_p13, %p422_p7 }
  0x44   : > { %p425_p6 = pnand %p424_p3, %p418_p0 }
  0x46   : > { %428 = shalt.err (!%p425_p6)
}
  0x47   : > { %s429_s28 = scalar_lea.hbm %s649_s23, 32  ;;  %s433_s4 = scalar_lea.hbm %s699_s3, 64 }
  0x48   : > { %p430_p4 = scmp.ne.s32.totalorder %s649_s23, %s429_s28  ;;  %p434_p1 = scmp.lt.u32.totalorder %s649_s23, %s699_s3 }
  0x49   : > { %p435_p2 = scmp.lt.u32.totalorder %s433_s4, %s429_s28  ;;  %p437_p8 = scmp.lt.u32.totalorder %s429_s28, %s649_s23 }
  0x4a   : > { %p431_p10 = pnand %p430_p4, %p708_p9 }
  0x4b   : > { %p436_p5 = por %p435_p2, %p434_p1 }
  0x4c   : > { %p432_p12 = pneg %p431_p10 }
  0x4d   : > { %p438_p11 = por %p437_p8, %p436_p5 }
  0x4f   : > { %p439_p0 = pnand %p438_p11, %p432_p12 }
  0x51   : > { %442 = shalt.err (!%p439_p0)
}
  0x52   : > { %325 = dma.vmem_to_hbm [thread:$0]  (%p708_p9), %s644_s7, 32, %s649_s23, %s200_s20  }
  0x53 PF: > { %s226_s5 = sand.u32 1, %s477_s12   ;;  %p709_p7 = scmp.ne.s32.totalorder %s704_s26, 0 }
  0x54   : > { %p710_p13 = scmp.ge.s32.totalorder %s497_s16, 2  ;;  %s227_s8 = scalar_lea.sflag [#allocation6], %s226_s5 }
  0x56   : > { %p332_p3 = pnand %p710_p13, %p709_p7 }
  0x58   : > { %472 = dma.done.wait (!%p332_p3), %s227_s8, 32  }
  0x59   : > { %474 = vsyncadd (!%p332_p3), %s227_s8, 4294967264  ;;  %s20_s16 = sadd.s32 1, %s497_s16   ;;  %s711_s12 = smov %s481_s13 }
  0x5a   : > { %p17_p6 = scmp.ge.s32.totalorder %s20_s16, 4   ;;  %s712_s13 = smov %s485_s14 }
  0x5b   : > { %s713_s14 = smov %s577_s25  ;;  %s714_s0 = smov %s493_s15 }
  0x5c   : > { %s715_s15 = smov %s717_s19  ;;  %19 = sbr.rel (!%p17_p6) target bundleno = 6 (0x6), region = 76 }
  0x63   :  { %232 = vsyncpa [#allocation5], 1 }
  0x64   :  { %234 = vsyncpa [#allocation5 + $0x1], 1 }
  0x65   :  { %235 = vsyncpa [#allocation6], 1 }
  0x66   :  { %237 = vsyncpa [#allocation6 + $0x1], 1 }

</bundles_post_ra>
